<compile_context>
chip_gen: v7x
topology: tpu7x:2x2x1
jax: 0.10.0
libtpu: 0.0.40
codegen_flags: <defaults>
</compile_context>

<pallas_src>
import functools

import jax
import jax.numpy as jnp
from jax import lax
from jax.experimental import pallas as pl
from jax.experimental.pallas import tpu as pltpu

ALPHA = 1.0
GAMMA = 2.0          # implemented as an explicit square (gamma == 2)
LANE = 128
TARGET_TILE_R = 1024  # 1024x128 f32 = 512 KiB/block; 2 in x 2 bufs = 2 MiB VMEM
NUM_CORE_SPLITS = 2   # leading "parallel" grid axis (both TCs on v7x)


def _focal_mse_kernel(x_ref, y_ref, o_ref, acc_ref, *,
                      total_n, tiles_per_split, tile_r, has_pad):
    c = pl.program_id(0)   # core-split axis ("parallel")
    i = pl.program_id(1)   # reduction axis  ("arbitrary")

    @pl.when(i == 0)
    def _():
        acc_ref[...] = jnp.zeros_like(acc_ref)

    x = x_ref[...].astype(jnp.float32)
    t = y_ref[...].astype(jnp.float32)

    # Numerically-stable BCE-with-logits sharing a single exp(-|x|):
    #   e = exp(-|x|), z = 1 + e
    #   bce     = max(x,0) - x*t + log(z)
    #   sigmoid = 1/z (x >= 0)  else  e/z
    #   pt      = exp(-bce) = exp(x*t - max(x,0)) / z
    e = jnp.exp(-jnp.abs(x))
    z = 1.0 + e
    inv_z = 1.0 / z           # exact reciprocal (keeps parity with torch sigmoid)
    log_z = jnp.log(z)
    relu_x = jnp.maximum(x, 0.0)
    xt = x * t

    bce = relu_x - xt + log_z
    pt = jnp.exp(xt - relu_x) * inv_z
    one_m_pt = 1.0 - pt
    focal = ALPHA * one_m_pt * one_m_pt * bce   # gamma == 2 -> explicit square

    p = jnp.where(x >= 0.0, inv_z, e * inv_z)   # sigmoid(x)
    diff = p - t
    val = focal + diff * diff

    if has_pad:
        # Zero out contributions from the zero-padded tail elements.
        start_row = (c * tiles_per_split + i) * tile_r
        row_iota = lax.broadcasted_iota(jnp.int32, (tile_r, LANE), 0)
        lane_iota = lax.broadcasted_iota(jnp.int32, (tile_r, LANE), 1)
        idx = (start_row + row_iota) * LANE + lane_iota
        val = jnp.where(idx < total_n, val, 0.0)

    # vreg-wide partial sums: fold the tile down onto one (8, 128) accumulator
    # with pure VPU adds (no per-step cross-lane reduce, no scalar chain).
    acc_ref[...] += jnp.sum(val.reshape(tile_r // 8, 8, LANE), axis=0)

    @pl.when(i == pl.num_programs(1) - 1)
    def _():
        o_ref[...] = acc_ref[...]


def focal_mse_mix_loss(logits, y):
    """logits, y: same shape (e.g. NCHW [B,C,H,W]). Returns scalar f32 loss."""
    assert logits.shape == y.shape
    total_n = logits.size

    itemsize = max(jnp.dtype(logits.dtype).itemsize, jnp.dtype(y.dtype).itemsize)
    align = {4: 8, 2: 16, 1: 32}.get(itemsize, 8)   # sublane packing per dtype

    rows = pl.cdiv(total_n, LANE)
    rows_per_split = pl.cdiv(rows, NUM_CORE_SPLITS)
    tile_r = min(TARGET_TILE_R, align * pl.cdiv(rows_per_split, align))
    tiles_per_split = pl.cdiv(rows, NUM_CORE_SPLITS * tile_r)
    rows_padded = NUM_CORE_SPLITS * tiles_per_split * tile_r
    padded_n = rows_padded * LANE
    has_pad = padded_n != total_n

    def slab(a):
        flat = a.reshape(-1)
        if has_pad:
            flat = jnp.pad(flat, (0, padded_n - total_n))
        return flat.reshape(rows_padded, LANE)

    x2 = slab(logits)   # native dtype -- no wrapper up-cast (halves HBM traffic
    y2 = slab(y)        # for bf16 inputs); the kernel casts tiles to f32.

    kernel = functools.partial(
        _focal_mse_kernel, total_n=total_n, tiles_per_split=tiles_per_split,
        tile_r=tile_r, has_pad=has_pad)

    partials = pl.pallas_call(
        kernel,
        out_shape=jax.ShapeDtypeStruct((NUM_CORE_SPLITS * 8, LANE), jnp.float32),
        grid_spec=pltpu.PrefetchScalarGridSpec(
            num_scalar_prefetch=0,
            grid=(NUM_CORE_SPLITS, tiles_per_split),
            in_specs=[
                pl.BlockSpec((tile_r, LANE),
                             lambda c, i: (c * tiles_per_split + i, 0)),
                pl.BlockSpec((tile_r, LANE),
                             lambda c, i: (c * tiles_per_split + i, 0)),
            ],
            out_specs=pl.BlockSpec((8, LANE), lambda c, i: (c, 0)),
            scratch_shapes=[pltpu.VMEM((8, LANE), jnp.float32)],
        ),
        compiler_params=pltpu.CompilerParams(
            dimension_semantics=("parallel", "arbitrary")),
    )(x2, y2)

    # Tiny final reduce (2 x 8 x 128 elements) + scale by 1/N in plain JAX.
    return jnp.sum(partials) * jnp.float32(1.0 / total_n)


def _reference(logits, y):
    x = logits.astype(jnp.float32)
    t = y.astype(jnp.float32)
    bce = jnp.maximum(x, 0.0) - x * t + jnp.log1p(jnp.exp(-jnp.abs(x)))
    pt = jnp.exp(-bce)
    focal = jnp.mean(ALPHA * (1.0 - pt) ** GAMMA * bce)
    mse = jnp.mean((jax.nn.sigmoid(x) - t) ** 2)
    return focal + mse


if __name__ == "__main__":
    key = jax.random.PRNGKey(0)
    k1, k2 = jax.random.split(key)
    B, C, H, W = 2, 4, 16, 16  # NCHW, 2048 elements total
    logits = jax.random.normal(k1, (B, C, H, W), dtype=jnp.float32)
    y = jax.random.bernoulli(k2, 0.5, (B, C, H, W)).astype(jnp.float32)

    loss = focal_mse_mix_loss(logits, y)
    loss = jax.block_until_ready(loss)

    ref = jax.block_until_ready(_reference(logits, y))
    assert jnp.allclose(loss, ref, rtol=1e-5, atol=1e-5), (loss, ref)
    print("KERNEL_OK")
</pallas_src>

<mosaic_0001>
module attributes {stable_mosaic.version = 11 : i64} {
  func.func @_focal_mse_kernel(%arg0: i32, %arg1: i32, %arg2: memref<8x128xf32, #tpu.memory_space<vmem>>, %arg3: memref<8x128xf32, #tpu.memory_space<vmem>>, %arg4: memref<8x128xf32, #tpu.memory_space<vmem>>, %arg5: memref<8x128xf32, #tpu.memory_space<vmem>>) attributes {dimension_semantics = [#tpu.dimension_semantics<parallel>, #tpu.dimension_semantics<arbitrary>], iteration_bounds = array<i64: 2, 1>, scalar_prefetch = 0 : i64, scratch_operands = 1 : i64, tpu.core_type = #tpu.core_type<tc>, window_params = [{transform_indices = @transform_0, window_bounds = array<i64: 8, 128>}, {transform_indices = @transform_1, window_bounds = array<i64: 8, 128>}, {transform_indices = @transform_2, window_bounds = array<i64: 8, 128>}]} {
    %c0_i32 = arith.constant 0 : i32
    %0 = arith.cmpi eq, %arg1, %c0_i32 : i32
    %1 = arith.extui %0 : i1 to i32
    %c0_i32_0 = arith.constant 0 : i32
    %2 = arith.cmpi ne, %1, %c0_i32_0 : i32
    scf.if %2 {
      %cst_17 = arith.constant 0.000000e+00 : f32
      %43 = vector.broadcast %cst_17 : f32 to vector<8x128xf32>
      %c0_18 = arith.constant 0 : index
      %c0_19 = arith.constant 0 : index
      %44 = vector.load %arg5[%c0_18, %c0_19] : memref<8x128xf32, #tpu.memory_space<vmem>>, vector<8x128xf32>
      tpu.vector_store %arg5[%c0_18, %c0_19], %43 {strides = array<i32>} : memref<8x128xf32, #tpu.memory_space<vmem>>, vector<8x128xf32>,
    } else {
    }
    %c0 = arith.constant 0 : index
    %c0_1 = arith.constant 0 : index
    %3 = vector.load %arg2[%c0, %c0_1] : memref<8x128xf32, #tpu.memory_space<vmem>>, vector<8x128xf32>
    %c0_2 = arith.constant 0 : index
    %c0_3 = arith.constant 0 : index
    %4 = vector.load %arg3[%c0_2, %c0_3] : memref<8x128xf32, #tpu.memory_space<vmem>>, vector<8x128xf32>
    %5 = math.absf %3 : vector<8x128xf32>
    %cst = arith.constant 0.000000e+00 : f32
    %6 = vector.broadcast %cst : f32 to vector<8x128xf32>
    %7 = arith.subf %6, %5 : vector<8x128xf32>
    %8 = math.exp %7 : vector<8x128xf32>
    %cst_4 = arith.constant 1.000000e+00 : f32
    %9 = vector.broadcast %cst_4 : f32 to vector<8x128xf32>
    %10 = arith.addf %9, %8 : vector<8x128xf32>
    %cst_5 = arith.constant 1.000000e+00 : f32
    %11 = vector.broadcast %cst_5 : f32 to vector<8x128xf32>
    %12 = arith.divf %11, %10 : vector<8x128xf32>
    %13 = math.log %10 : vector<8x128xf32>
    %cst_6 = arith.constant 0.000000e+00 : f32
    %14 = vector.broadcast %cst_6 : f32 to vector<8x128xf32>
    %15 = arith.maximumf %3, %14 : vector<8x128xf32>
    %16 = arith.mulf %3, %4 : vector<8x128xf32>
    %17 = arith.subf %15, %16 : vector<8x128xf32>
    %18 = arith.addf %17, %13 : vector<8x128xf32>
    %19 = arith.subf %16, %15 : vector<8x128xf32>
    %20 = math.exp %19 : vector<8x128xf32>
    %21 = arith.mulf %20, %12 : vector<8x128xf32>
    %cst_7 = arith.constant 1.000000e+00 : f32
    %22 = vector.broadcast %cst_7 : f32 to vector<8x128xf32>
    %23 = arith.subf %22, %21 : vector<8x128xf32>
    %cst_8 = arith.constant 1.000000e+00 : f32
    %24 = vector.broadcast %cst_8 : f32 to vector<8x128xf32>
    %25 = arith.mulf %24, %23 : vector<8x128xf32>
    %26 = arith.mulf %25, %23 : vector<8x128xf32>
    %27 = arith.mulf %26, %18 : vector<8x128xf32>
    %cst_9 = arith.constant 0.000000e+00 : f32
    %28 = vector.broadcast %cst_9 : f32 to vector<8x128xf32>
    %29 = arith.cmpf oge, %3, %28 : vector<8x128xf32>
    %30 = arith.mulf %8, %12 : vector<8x128xf32>
    %31 = arith.select %29, %12, %30 : vector<8x128xi1>, vector<8x128xf32>
    %32 = arith.subf %31, %4 : vector<8x128xf32>
    %33 = arith.mulf %32, %32 : vector<8x128xf32>
    %34 = arith.addf %27, %33 : vector<8x128xf32>
    %c0_10 = arith.constant 0 : index
    %c0_11 = arith.constant 0 : index
    %35 = vector.load %arg5[%c0_10, %c0_11] : memref<8x128xf32, #tpu.memory_space<vmem>>, vector<8x128xf32>
    %36 = vector.shape_cast %34 : vector<8x128xf32> to vector<1x8x128xf32>
    %cst_12 = arith.constant dense<0.000000e+00> : vector<8x128xf32>
    %37 = vector.multi_reduction <add>, %36, %cst_12 [0] : vector<1x8x128xf32> to vector<8x128xf32>
    %38 = arith.addf %35, %37 : vector<8x128xf32>
    %c0_13 = arith.constant 0 : index
    %c0_14 = arith.constant 0 : index
    %39 = vector.load %arg5[%c0_13, %c0_14] : memref<8x128xf32, #tpu.memory_space<vmem>>, vector<8x128xf32>
    tpu.vector_store %arg5[%c0_13, %c0_14], %38 {strides = array<i32>} : memref<8x128xf32, #tpu.memory_space<vmem>>, vector<8x128xf32>,
    %c0_i32_15 = arith.constant 0 : i32
    %40 = arith.cmpi eq, %arg1, %c0_i32_15 : i32
    %41 = arith.extui %40 : i1 to i32
    %c0_i32_16 = arith.constant 0 : i32
    %42 = arith.cmpi ne, %41, %c0_i32_16 : i32
    scf.if %42 {
      %c0_17 = arith.constant 0 : index
      %c0_18 = arith.constant 0 : index
      %43 = vector.load %arg5[%c0_17, %c0_18] : memref<8x128xf32, #tpu.memory_space<vmem>>, vector<8x128xf32>
      %c0_19 = arith.constant 0 : index
      %c0_20 = arith.constant 0 : index
      %44 = vector.load %arg4[%c0_19, %c0_20] : memref<8x128xf32, #tpu.memory_space<vmem>>, vector<8x128xf32>
      tpu.vector_store %arg4[%c0_19, %c0_20], %43 {strides = array<i32>} : memref<8x128xf32, #tpu.memory_space<vmem>>, vector<8x128xf32>,
    } else {
    }
    return
  }
  func.func @transform_0(%arg0: i32, %arg1: i32) -> (i32, i32) {
    %c1_i32 = arith.constant 1 : i32
    %0 = arith.muli %arg0, %c1_i32 : i32
    %1 = arith.addi %0, %arg1 : i32
    %c0_i32 = arith.constant 0 : i32
    %c0_i32_0 = arith.constant 0 : i32
    return %1, %c0_i32 : i32, i32
  }
  func.func @transform_1(%arg0: i32, %arg1: i32) -> (i32, i32) {
    %c1_i32 = arith.constant 1 : i32
    %0 = arith.muli %arg0, %c1_i32 : i32
    %1 = arith.addi %0, %arg1 : i32
    %c0_i32 = arith.constant 0 : i32
    %c0_i32_0 = arith.constant 0 : i32
    return %1, %c0_i32 : i32, i32
  }
  func.func @transform_2(%arg0: i32, %arg1: i32) -> (i32, i32) {
    %c0_i32 = arith.constant 0 : i32
    %c0_i32_0 = arith.constant 0 : i32
    return %arg0, %c0_i32 : i32, i32
  }
}

</mosaic_0001>

<bundles_post_ra>
// kernel: tpu_custom_call.1
= control target key start
LH: loop header
LB: loop body
LE: loop exit
PB: predicated region body
PF: predicated region fallthrough
CT: control target
= control target key end

     0   :  { %7 = vsyncpa [#allocation4], 0  ;;  %s857_s0 = inlined_call_operand.hbm [shape: f32[16,128], index: 0, kind: input, shape index: {}]   ;;  %s858_s1 = inlined_call_operand.hbm [shape: f32[16,128], index: 1, kind: input, shape index: {}]   ;;  %s859_s2 = inlined_call_operand.hbm [shape: f32[16,128], index: 2, kind: output, shape index: {}]  }
   0x1   :  { %9 = vsyncpa [#allocation4 + $0x1], 0 }
   0x2   :  { %10 = vsyncpa [#allocation7], 0 }
   0x3   :  { %12 = vsyncpa [#allocation7 + $0x1], 0 }
   0x4   :  { %13 = vsyncpa [#allocation5], 0 }
   0x5   :  { %15 = vsyncpa [#allocation5 + $0x1], 0  ;;  %s632_s9 = smov 0   ;;  %s634_s10 = smov 0  }
   0x6   :  { %s636_s11 = smov 0   ;;  %s638_s12 = smov 0  }
   0x7   :  { %s640_s13 = smov 0   ;;  %s642_s14 = smov 0  }
   0x8 LB: > { %s375_s15 = sadd.s32 4294967295, %s612_s14   ;;  %s376_s16 = sadd.s32 4294967294, %s612_s14   ;;  %s612_s14 = sphi %s642_s14, %s21_s14   ;;  %s608_s13 = sphi %s640_s13, %s879_s13   ;;  %s604_s12 = sphi %s638_s12, %s878_s12   ;;  %s600_s11 = sphi %s636_s11, %s877_s11   ;;  %s596_s10 = sphi %s634_s10, %s876_s10   ;;  %s592_s9 = sphi %s632_s9, %s875_s9  }
   0x9   : > { %s33_s17 = sadd.s32 1, %s608_s13  ;;  %s42_s18 = sadd.s32 1, %s600_s11 }
   0xa   : > { %p35_p0 = scmp.ge.s32.totalorder %s33_s17, 2  ;;  %p49_p1 = scmp.ne.s32.totalorder %s600_s11, %s596_s10 }
   0xb   : > { %p50_p2 = scmp.eq.s32.totalorder %s612_s14, 0  ;;  %p55_p3 = scmp.ne.s32.totalorder %s596_s10, %s592_s9 }
   0xc   : > { %s881_s17 = smov (%p35_p0, %s33_s17), 0  ;;  %p56_p5 = scmp.eq.s32.totalorder %s375_s15, 0 }
   0xd   : > { %p673_p4 = por %p50_p2, %p49_p1  ;;  %s39_s20 = ssub.s32 %s608_s13, %s881_s17 }
   0xe   : > { %p107_p6 = scmp.eq.s32.totalorder %s375_s15, 1  ;;  %p40_p7 = scmp.eq.s32.totalorder %s39_s20, 0 }
   0xf   : > { %p679_p8 = por %p56_p5, %p55_p3  ;;  %p113_p10 = scmp.eq.s32.totalorder %s376_s16, 1 }
  0x10   : > { %p683_p9 = por %p107_p6, %p49_p1  ;;  %p408_p13 = scmp.lt.s32.totalorder %s612_s14, 2 }
  0x11   : > { %s863_s21 = scalar_select %p679_p8, 1, 0 }
  0x12   : > { %s864_s22 = scalar_select %p683_p9, 1, 0 }
  0x13   : > { %s688_s23 = scalar_select %p40_p7, %s600_s11, %s42_s18  }
  0x14   : > { %p690_p11 = por %p113_p10, %p55_p3  ;;  %s697_s25 = sand.u32 1, %s600_s11  }
  0x15   : > { %s379_s26 = sshll.u32 %s697_s25, 3  ;;  %s380_s27 = sshll.u32 %s608_s13, 7 }
  0x16   : > { %s865_s24 = scalar_select %p690_p11, 1, 0 }
  0x17   : > { %s706_s30 = scalar_lea.hbm %s857_s0, %s380_s27  ;;  %s137_s3 = scalar_lea.vmem [#allocation3], %s379_s26 }
  0x18   : > { %s145_s4 = sshll.u32 %s137_s3, 4  ;;  %p714_p0 = pnand %p408_p13, %p673_p4  ;;  %s710_s4 = int_to_ptr.vmem [resolvable:$true] %s145_s4 }
  0x19   : > { %s134_s6 = scalar_lea.sflag [#allocation4], %s697_s25  ;;  %s466_s7 = scalar_lea.hbm %s706_s30, 128 }
  0x1a   : > { %p467_p3 = scmp.ne.s32.totalorder %s706_s30, %s466_s7  ;;  %p468_p5 = pneg %p714_p0 }
  0x1b   : > { %s471_s16 = scalar_lea.hbm %s857_s0, 256  ;;  %p472_p4 = scmp.lt.u32.totalorder %s706_s30, %s857_s0 }
  0x1c   : > { %p469_p6 = pnand %p468_p5, %p467_p3  ;;  %p473_p10 = scmp.lt.u32.totalorder %s471_s16, %s466_s7 }
  0x1d   : > { %p475_p12 = scmp.lt.u32.totalorder %s466_s7, %s706_s30 }
  0x1e   : > { %p470_p7 = pneg %p469_p6  ;;  %p474_p13 = por %p473_p10, %p472_p4 }
  0x20   : > { %p476_p1 = por %p475_p12, %p474_p13 }
  0x22   : > { %p477_p2 = pnand %p476_p1, %p470_p7 }
  0x24   : > { %480 = shalt.err (!%p477_p2)
}
  0x25   : > { %s481_s20 = scalar_lea.vmem %s710_s4, 128  ;;  %s614_s28 = smov [#allocation3]  }
  0x26   : > { %p482_p3 = scmp.ne.s32.totalorder %s710_s4, %s481_s20  ;;  %s486_s29 = sshll.u32 %s614_s28, 4  ;;  %s487_s29 = int_to_ptr.vmem [resolvable:$false] %s486_s29 }
  0x27   : > { %s488_s3 = scalar_lea.vmem %s487_s29, 256  ;;  %p489_p9 = scmp.lt.s32.totalorder %s710_s4, %s487_s29 }
  0x28   : > { %p484_p6 = pnand %p482_p3, %p468_p5  ;;  %p490_p4 = scmp.lt.s32.totalorder %s488_s3, %s481_s20 }
  0x2a   : > { %p485_p11 = pneg %p484_p6  ;;  %p491_p10 = por %p490_p4, %p489_p9 }
  0x2c   : > { %p492_p12 = pnand %p491_p10, %p485_p11 }
  0x2e   : > { %495 = shalt.err (!%p492_p12)
}
  0x2f   : > { %400 = dma.hbm_to_vmem [thread:$0]  (!%p714_p0), %s706_s30, 128, %s710_s4, %s134_s6  }
  0x30   : > { %p867_p1 = scmp.lt.s32.totalorder %s612_s14, 3  ;;  %p868_p2 = scmp.ge.s32.totalorder %s612_s14, 1 }
  0x31   : > { %s759_s16 = scalar_lea.hbm %s858_s1, %s380_s27  ;;  %s156_s18 = scalar_lea.vmem [#allocation6], %s379_s26 }
  0x32   : > { %p750_p7 = pnand %p868_p2, %p867_p1  ;;  %s164_s19 = sshll.u32 %s156_s18, 4  ;;  %s165_s19 = int_to_ptr.vmem [resolvable:$true] %s164_s19 }
  0x33   : > { %s153_s30 = scalar_lea.sflag [#allocation7], %s697_s25  ;;  %s496_s4 = scalar_lea.hbm %s759_s16, 128 }
  0x34   : > { %s869_s7 = scalar_select %p750_p7, 1, 0 }
  0x35   : > { %p497_p9 = scmp.ne.s32.totalorder %s759_s16, %s496_s4  ;;  %s501_s27 = scalar_lea.hbm %s858_s1, 256 }
  0x36   : > { %p502_p3 = scmp.lt.u32.totalorder %s759_s16, %s858_s1  ;;  %p503_p6 = scmp.lt.u32.totalorder %s501_s27, %s496_s4 }
  0x37   : > { %p499_p11 = pnand %p497_p9, %p468_p5  ;;  %p505_p10 = scmp.lt.u32.totalorder %s496_s4, %s759_s16 }
  0x38   : > { %p504_p4 = por %p503_p6, %p502_p3 }
  0x39   : > { %p500_p13 = pneg %p499_p11 }
  0x3a   : > { %p506_p12 = por %p505_p10, %p504_p4 }
  0x3c   : > { %p507_p1 = pnand %p506_p12, %p500_p13 }
  0x3e   : > { %510 = shalt.err (!%p507_p1)
}
  0x3f   : > { %s511_s25 = scalar_lea.vmem %s165_s19, 128  ;;  %s615_s26 = smov [#allocation6]  }
  0x40   : > { %p512_p2 = scmp.ne.s32.totalorder %s165_s19, %s511_s25  ;;  %s516_s3 = sshll.u32 %s615_s26, 4  ;;  %s517_s3 = int_to_ptr.vmem [resolvable:$false] %s516_s3 }
  0x41   : > { %s518_s8 = scalar_lea.vmem %s517_s3, 256  ;;  %p519_p8 = scmp.lt.s32.totalorder %s165_s19, %s517_s3 }
  0x42   : > { %p514_p9 = pnand %p512_p2, %p468_p5  ;;  %p520_p7 = scmp.lt.s32.totalorder %s518_s8, %s511_s25 }
  0x44   : > { %p515_p11 = pneg %p514_p9  ;;  %p521_p3 = por %p520_p7, %p519_p8 }
  0x46   : > { %p522_p6 = pnand %p521_p3, %p515_p11 }
  0x48   : > { %525 = shalt.err (!%p522_p6)
}
  0x49   : > { %403 = dma.hbm_to_vmem [thread:$0]  (!%p714_p0), %s759_s16, 128, %s165_s19, %s153_s30  }
  0x4a   : > { %p870_p13 = scmp.ne.s32.totalorder %s869_s7, 0 }
  0x4b   : > { %s786_s15 = sand.u32 (!%p870_p13), 1, %s596_s10   ;;  %p871_p8 = scmp.ne.s32.totalorder (!%p870_p13), %s863_s21, 0 }
  0x4c   : > { %173 = sbr.rel (%p870_p13) target bundleno = 141 (0x8d), region = 28  ;;  %s789_s18 = sshll.u32 (!%p870_p13), %s786_s15, 3 }
  0x4d   : > { %s176_s4 = scalar_lea.sflag (!%p870_p13), [#allocation4], %s786_s15  ;;  %s179_s6 = scalar_lea.vmem (!%p870_p13), [#allocation3], %s789_s18 }
  0x53   : > { %579 = dma.done.wait (%p871_p8), %s176_s4, 128  }
  0x54   : > { %581 = vsyncadd (%p871_p8), %s176_s4, 4294967168  ;;  %s185_s5 = scalar_lea.sflag [#allocation7], %s786_s15  ;;  %s188_s7 = scalar_lea.vmem [#allocation6], %s789_s18 }
  0x55   : > { %583 = dma.done.wait (%p871_p8), %s185_s5, 128  }
  0x56   : > { %585 = vsyncadd (%p871_p8), %s185_s5, 4294967168  ;;  %v221_v0 = vld [vmem:[%s179_s6] sm:$0xff]  ;;  %v222_v2 = vld [vmem:[%s188_s7] sm:$0xff]  ;;  %s213_s21 = scalar_lea.vmem [#allocation8], %s789_s18  ;;  %s388_s19 = sshll.u32 %s604_s12, 7 }
  0x57   : > { %v223_v1 = vand.u32 2147483647, %v221_v0  ;;  %v232_v5 = vmax.f32 %v221_v0, 0.0  ;;  %v233_v6 = vmul.f32 %v222_v2, %v221_v0  ;;  %vm243_vm0 = vcmp.ge.f32.partialorder %v221_v0, 0.0  ;;  %s272_s16 = sshll.u32 %s213_s21, 4  ;;  %s810_s27 = scalar_lea.hbm %s859_s2, %s388_s19  ;;  %s805_s16 = int_to_ptr.vmem [resolvable:$true] %s272_s16 }
  0x58   : > { %s259_s28 = scalar_lea.sflag [#allocation5], %s786_s15  ;;  %s526_s29 = scalar_lea.vmem %s805_s16, 128 }
  0x59   : > { %v224_v3 = vsub.f32 0.0, %v223_v1  ;;  %v236_v7 = vsub.f32 %v233_v6, %v232_v5  ;;  %v234_v13 = vsub.f32 %v232_v5, %v233_v6  ;;  %p527_p0 = scmp.ne.s32.totalorder %s805_s16, %s526_s29  ;;  %p872_p5 = scmp.ne.s32.totalorder %s864_s22, 0 }
  0x5a   : > { %s616_s12 = smov [#allocation8]  }
  0x5b   : > { %v225_v4 = vmul.f32 1.442695, %v224_v3  ;;  %v237_v8 = vmul.f32 1.442695, %v236_v7  ;;  %p528_p7 = pnand %p527_p0, %p872_p5  ;;  %s530_s25 = sshll.u32 %s616_s12, 4  ;;  %s531_s25 = int_to_ptr.vmem [resolvable:$false] %s530_s25 }
  0x5c   : > { %s532_s26 = scalar_lea.vmem %s531_s25, 256  ;;  %p533_p10 = scmp.lt.s32.totalorder %s805_s16, %s531_s25 }
  0x5d   : > { %458 = vpow2.f32 %v225_v4  ;;  %p529_p4 = pneg %p528_p7  ;;  %p534_p12 = scmp.lt.s32.totalorder %s532_s26, %s526_s29 }
  0x5e   : > { %460 = vpow2.f32 %v237_v8 }
  0x5f   : > { %p535_p1 = por %p534_p12, %p533_p10 }
  0x61   : > { %p536_p2 = pnand %p535_p1, %p529_p4 }
  0x67   : > { %v459_v9 = vpop.eup %458 }
  0x68   : > { %v227_v10 = vadd.f32 1.0, %v459_v9  ;;  %v461_v11 = vpop.eup %460 }
  0x6a   : > { %462 = vrcp.f32 %v227_v10 }
  0x6b   : > { %464 = vlog2.f32 %v227_v10 }
  0x74   : > { %v463_v12 = vpop.eup %462 }
  0x75   : > { %v465_v14 = vpop.eup %464  ;;  %v239_v15 = vmul.f32 %v463_v12, %v461_v11  ;;  %v244_v16 = vmul.f32 %v463_v12, %v459_v9 }
  0x76   : > { %v231_v17 = vmul.f32 0.6931472, %v465_v14 }
  0x77   : > { %v240_v18 = vsub.f32 1.0, %v239_v15  ;;  %v245_v19 = vsel %vm243_vm0, %v463_v12, %v244_v16 }
  0x78   : > { %v235_v20 = vadd.f32 %v234_v13, %v231_v17  ;;  %v246_v21 = vsub.f32 %v245_v19, %v222_v2 }
  0x79   : > { %v241_v22 = vmul.f32 %v240_v18, %v240_v18 }
  0x7a   : > { %v247_v23 = vmul.f32 %v246_v21, %v246_v21 }
  0x7b   : > { %v242_v24 = vmul.f32 %v241_v22, %v235_v20 }
  0x7d   : > { %v248_v25 = vadd.f32 %v247_v23, %v242_v24 }
  0x7f   : > { %257 = vst [vmem:[%s213_s21] sm:$0xff] %v248_v25 }
  0x80   : > { %539 = shalt.err (!%p536_p2)
}
  0x81   : > { %s540_s3 = scalar_lea.hbm %s810_s27, 128  ;;  %s544_s18 = scalar_lea.hbm %s859_s2, 256 }
  0x82   : > { %p541_p9 = scmp.ne.s32.totalorder %s810_s27, %s540_s3  ;;  %p545_p6 = scmp.lt.u32.totalorder %s810_s27, %s859_s2 }
  0x83   : > { %p546_p13 = scmp.lt.u32.totalorder %s544_s18, %s540_s3  ;;  %p548_p0 = scmp.lt.u32.totalorder %s540_s3, %s810_s27 }
  0x84   : > { %p542_p11 = pnand %p541_p9, %p872_p5 }
  0x85   : > { %p547_p8 = por %p546_p13, %p545_p6 }
  0x86   : > { %p543_p3 = pneg %p542_p11 }
  0x87   : > { %p549_p7 = por %p548_p0, %p547_p8 }
  0x89   : > { %p550_p4 = pnand %p549_p7, %p543_p3 }
  0x8b   : > { %553 = shalt.err (!%p550_p4)
}
  0x8c   : > { %395 = dma.vmem_to_hbm [thread:$0]  (%p872_p5), %s805_s16, 128, %s810_s27, %s259_s28  }
  0x8d PF: > { %s284_s5 = sand.u32 1, %s592_s9   ;;  %p873_p10 = scmp.ne.s32.totalorder %s865_s24, 0 }
  0x8e   : > { %p874_p12 = scmp.ge.s32.totalorder %s612_s14, 2  ;;  %s285_s7 = scalar_lea.sflag [#allocation5], %s284_s5 }
  0x90   : > { %p405_p1 = pnand %p874_p12, %p873_p10 }
  0x92   : > { %587 = dma.done.wait (!%p405_p1), %s285_s7, 128  }
  0x93   : > { %589 = vsyncadd (!%p405_p1), %s285_s7, 4294967168  ;;  %s21_s14 = sadd.s32 1, %s612_s14   ;;  %s875_s9 = smov %s596_s10 }
  0x94   : > { %p18_p2 = scmp.ge.s32.totalorder %s21_s14, 4   ;;  %s876_s10 = smov %s600_s11 }
  0x95   : > { %s877_s11 = smov %s688_s23  ;;  %s878_s12 = smov %s608_s13 }
  0x96   : > { %s879_s13 = smov %s881_s17  ;;  %20 = sbr.rel (!%p18_p2) target bundleno = 8 (0x8), region = 94 }
  0x9d   :  { %290 = vsyncpa [#allocation4], 1 }
  0x9e   :  { %292 = vsyncpa [#allocation4 + $0x1], 1 }
  0x9f   :  { %293 = vsyncpa [#allocation7], 1 }
  0xa0   :  { %295 = vsyncpa [#allocation7 + $0x1], 1 }
  0xa1   :  { %296 = vsyncpa [#allocation5], 1 }
  0xa2   :  { %298 = vsyncpa [#allocation5 + $0x1], 1 }

</bundles_post_ra>
